<compile_context>
chip_gen: v7x
topology: tpu7x:2x2x1
jax: 0.10.0
libtpu: 0.0.40
codegen_flags: <defaults>
</compile_context>

<pallas_src>
import functools

import jax
import jax.numpy as jnp
from jax import lax
from jax.experimental import pallas as pl
from jax.experimental.pallas import tpu as pltpu

LANES = 128
NCORES = 2                           # leading "parallel" grid axis (v7x megacore)
MAX_BLOCK_BYTES = 2 * 1024 * 1024    # per-input-block VMEM budget (double-buffered)


def _cdiv(a, b):
    return -(-a // b)


def _round_up(a, m):
    return _cdiv(a, m) * m


def _eikonal_kernel(x_ref, out_ref, *, tile_r, steps_per_core, m_total, m_padded):
    c = pl.program_id(0)   # core split ("parallel")
    i = pl.program_id(1)   # streaming step ("arbitrary")

    @pl.when(i == 0)
    def _():
        out_ref[...] = jnp.zeros_like(out_ref)

    x = x_ref[...].astype(jnp.float32)            # (D, tile_r, 128), lane-dense
    sq = jnp.sum(x * x, axis=0)                   # (tile_r, 128): D slab adds (VPU)
    d = jnp.sqrt(sq) - 1.0
    contrib = d * d                               # (tile_r, 128)

    if m_padded != m_total:                       # static: mask only if padded
        base_row = (c * steps_per_core + i) * tile_r
        row = lax.broadcasted_iota(jnp.int32, (tile_r, LANES), 0)
        lane = lax.broadcasted_iota(jnp.int32, (tile_r, LANES), 1)
        ray = (base_row + row) * LANES + lane
        contrib = jnp.where(ray < m_total, contrib, 0.0)

    # VMEM-resident lane-dense accumulator; written back to HBM once per core.
    out_ref[...] += contrib[None]


@jax.jit
def eikonal_loss(nablas, coef):
    d = nablas.shape[-1]
    nab = nablas.reshape(-1, d)
    m_total = nab.shape[0]

    # Static tiling math (shapes are static under jit).
    rows_total = _cdiv(m_total, LANES)
    rows_per_core = _cdiv(rows_total, NCORES)
    rows_cap = max(8, (MAX_BLOCK_BYTES // (d * LANES * 4)) // 8 * 8)
    tile_r = min(rows_cap, _round_up(rows_per_core, 8))
    steps = _cdiv(rows_per_core, tile_r)
    rows_pad = NCORES * steps * tile_r
    m_padded = rows_pad * LANES

    # One fused pad + transpose + reshape copy -> component-major, lane-dense.
    nab = jnp.pad(nab, ((0, m_padded - m_total), (0, 0)))
    x = nab.T.reshape(d, rows_pad, LANES)

    kernel = functools.partial(
        _eikonal_kernel,
        tile_r=tile_r, steps_per_core=steps,
        m_total=m_total, m_padded=m_padded)

    partials = pl.pallas_call(
        kernel,
        out_shape=jax.ShapeDtypeStruct((NCORES, tile_r, LANES), jnp.float32),
        grid_spec=pltpu.PrefetchScalarGridSpec(
            num_scalar_prefetch=0,
            grid=(NCORES, steps),
            in_specs=[pl.BlockSpec((d, tile_r, LANES),
                                   lambda c, i: (0, c * steps + i, 0))],
            out_specs=pl.BlockSpec((1, tile_r, LANES),
                                   lambda c, i: (c, 0, 0)),
        ),
        compiler_params=pltpu.CompilerParams(
            dimension_semantics=("parallel", "arbitrary")),
    )(x)

    # Single cross-lane reduction of the lane-dense partials, once, in JAX.
    return coef * jnp.sum(partials) / m_total


if __name__ == "__main__":
    key = jax.random.PRNGKey(0)

    # Small SDF gradient field: batch=2, rays=177, samples-per-ray=24, xyz=3.
    B, R, S, D = 2, 177, 24, 3
    nablas = jax.random.normal(key, (B, R, S, D), dtype=jnp.float32) * 1.3

    coef = 0.1
    loss = eikonal_loss(nablas, coef)
    loss = jax.block_until_ready(loss)

    # Pure-JAX reference (same semantics as the PyTorch module).
    norm = jnp.sqrt(jnp.sum(nablas.astype(jnp.float32) ** 2, axis=-1))
    ref = coef * jnp.mean((norm - 1.0) ** 2)
    assert jnp.allclose(loss, ref, rtol=1e-5, atol=1e-6), (loss, ref)

    print("KERNEL_OK")
</pallas_src>

<mosaic_0001>
module attributes {stable_mosaic.version = 11 : i64} {
  func.func @_eikonal_kernel(%arg0: i32, %arg1: i32, %arg2: memref<3x40x128xf32, #tpu.memory_space<vmem>>, %arg3: memref<1x40x128xf32, #tpu.memory_space<vmem>>) attributes {dimension_semantics = [#tpu.dimension_semantics<parallel>, #tpu.dimension_semantics<arbitrary>], iteration_bounds = array<i64: 2, 1>, scalar_prefetch = 0 : i64, scratch_operands = 0 : i64, tpu.core_type = #tpu.core_type<tc>, window_params = [{transform_indices = @transform_0, window_bounds = array<i64: 3, 40, 128>}, {transform_indices = @transform_1, window_bounds = array<i64: 1, 40, 128>}]} {
    %c0_i32 = arith.constant 0 : i32
    %0 = arith.cmpi eq, %arg1, %c0_i32 : i32
    %1 = arith.extui %0 : i1 to i32
    %c0_i32_0 = arith.constant 0 : i32
    %2 = arith.cmpi ne, %1, %c0_i32_0 : i32
    scf.if %2 {
      %cst_11 = arith.constant 0.000000e+00 : f32
      %28 = vector.broadcast %cst_11 : f32 to vector<1x40x128xf32>
      %c0_12 = arith.constant 0 : index
      %c0_13 = arith.constant 0 : index
      %c0_14 = arith.constant 0 : index
      %29 = vector.load %arg3[%c0_12, %c0_13, %c0_14] : memref<1x40x128xf32, #tpu.memory_space<vmem>>, vector<1x40x128xf32>
      tpu.vector_store %arg3[%c0_12, %c0_13, %c0_14], %28 {strides = array<i32>} : memref<1x40x128xf32, #tpu.memory_space<vmem>>, vector<1x40x128xf32>,
    } else {
    }
    %c0 = arith.constant 0 : index
    %c0_1 = arith.constant 0 : index
    %c0_2 = arith.constant 0 : index
    %3 = vector.load %arg2[%c0, %c0_1, %c0_2] : memref<3x40x128xf32, #tpu.memory_space<vmem>>, vector<3x40x128xf32>
    %4 = arith.mulf %3, %3 : vector<3x40x128xf32>
    %cst = arith.constant dense<0.000000e+00> : vector<40x128xf32>
    %5 = vector.multi_reduction <add>, %4, %cst [0] : vector<3x40x128xf32> to vector<40x128xf32>
    %6 = math.sqrt %5 : vector<40x128xf32>
    %cst_3 = arith.constant 1.000000e+00 : f32
    %7 = vector.broadcast %cst_3 : f32 to vector<40x128xf32>
    %8 = arith.subf %6, %7 : vector<40x128xf32>
    %9 = arith.mulf %8, %8 : vector<40x128xf32>
    %c1_i32 = arith.constant 1 : i32
    %10 = arith.muli %arg0, %c1_i32 : i32
    %11 = arith.addi %10, %arg1 : i32
    %c40_i32 = arith.constant 40 : i32
    %12 = arith.muli %11, %c40_i32 : i32
    %13 = tpu.iota {dimensions = array<i32: 0>} : vector<40x128xi32>
    %14 = tpu.iota {dimensions = array<i32: 1>} : vector<40x128xi32>
    %15 = vector.broadcast %12 : i32 to vector<40x128xi32>
    %16 = arith.addi %15, %13 : vector<40x128xi32>
    %c128_i32 = arith.constant 128 : i32
    %17 = vector.broadcast %c128_i32 : i32 to vector<40x128xi32>
    %18 = arith.muli %16, %17 : vector<40x128xi32>
    %19 = arith.addi %18, %14 : vector<40x128xi32>
    %c8496_i32 = arith.constant 8496 : i32
    %20 = vector.broadcast %c8496_i32 : i32 to vector<40x128xi32>
    %21 = arith.cmpi slt, %19, %20 : vector<40x128xi32>
    %cst_4 = arith.constant 0.000000e+00 : f32
    %22 = vector.broadcast %cst_4 : f32 to vector<40x128xf32>
    %23 = arith.select %21, %9, %22 : vector<40x128xi1>, vector<40x128xf32>
    %c0_5 = arith.constant 0 : index
    %c0_6 = arith.constant 0 : index
    %c0_7 = arith.constant 0 : index
    %24 = vector.load %arg3[%c0_5, %c0_6, %c0_7] : memref<1x40x128xf32, #tpu.memory_space<vmem>>, vector<1x40x128xf32>
    %25 = vector.shape_cast %23 : vector<40x128xf32> to vector<1x40x128xf32>
    %26 = arith.addf %24, %25 : vector<1x40x128xf32>
    %c0_8 = arith.constant 0 : index
    %c0_9 = arith.constant 0 : index
    %c0_10 = arith.constant 0 : index
    %27 = vector.load %arg3[%c0_8, %c0_9, %c0_10] : memref<1x40x128xf32, #tpu.memory_space<vmem>>, vector<1x40x128xf32>
    tpu.vector_store %arg3[%c0_8, %c0_9, %c0_10], %26 {strides = array<i32>} : memref<1x40x128xf32, #tpu.memory_space<vmem>>, vector<1x40x128xf32>,
    return
  }
  func.func @transform_0(%arg0: i32, %arg1: i32) -> (i32, i32, i32) {
    %c1_i32 = arith.constant 1 : i32
    %0 = arith.muli %arg0, %c1_i32 : i32
    %1 = arith.addi %0, %arg1 : i32
    %c0_i32 = arith.constant 0 : i32
    %c0_i32_0 = arith.constant 0 : i32
    %c0_i32_1 = arith.constant 0 : i32
    return %c0_i32, %1, %c0_i32_0 : i32, i32, i32
  }
  func.func @transform_1(%arg0: i32, %arg1: i32) -> (i32, i32, i32) {
    %c0_i32 = arith.constant 0 : i32
    %c0_i32_0 = arith.constant 0 : i32
    %c0_i32_1 = arith.constant 0 : i32
    return %arg0, %c0_i32, %c0_i32_0 : i32, i32, i32
  }
}

</mosaic_0001>

<bundles_post_ra>
// kernel: eikonal_loss.1
= control target key start
LH: loop header
LB: loop body
LE: loop exit
PB: predicated region body
PF: predicated region fallthrough
CT: control target
= control target key end

     0   :  { %s559_s6 = smov 0   ;;  %s561_s7 = smov 0   ;;  %s692_s0 = inlined_call_operand.vmem [shape: f32[3,80,128], index: 0, kind: input, shape index: {}]   ;;  %s693_s1 = inlined_call_operand.vmem [shape: f32[2,40,128], index: 1, kind: output, shape index: {}]  }
   0x1   :  { %s563_s8 = smov 0   ;;  %s565_s9 = smov 0  }
   0x2   :  { %s567_s10 = smov 0  }
   0x3 LB: > { %s23_s11 = sadd.s32 1, %s543_s9  ;;  %p39_p1 = scmp.ne.s32.totalorder %s535_s7, %s531_s6  ;;  %s547_s10 = sphi %s567_s10, %s11_s10   ;;  %s543_s9 = sphi %s565_s9, %s697_s9   ;;  %s539_s8 = sphi %s563_s8, %s696_s8   ;;  %s535_s7 = sphi %s561_s7, %s695_s7   ;;  %s531_s6 = sphi %s559_s6, %s694_s6  }
   0x4   : > { %p25_p0 = scmp.ge.s32.totalorder %s23_s11, 2  ;;  %p40_p2 = scmp.eq.s32.totalorder %s547_s10, 0 }
   0x5   : > { %s32_s13 = sadd.s32 1, %s535_s7  ;;  %p443_p5 = scmp.ge.s32.totalorder %s547_s10, 2 }
   0x6   : > { %s699_s11 = smov (%p25_p0, %s23_s11), 0  ;;  %p41_p3 = por %p40_p2, %p39_p1 }
   0x7   : > { %s29_s12 = ssub.s32 %s543_s9, %s699_s11  ;;  %91 = sbr.rel (%p443_p5) target bundleno = 27 (0x1b), region = 16 }
   0x8   : > { %p30_p4 = scmp.eq.s32.totalorder %s29_s12, 0 }
   0xa   : > { %s594_s14 = scalar_select %p30_p4, %s535_s7, %s32_s13  }
   0xe   : > { %94 = sbr.rel (!%p41_p3) target bundleno = 27 (0x1b), region = 20  ;;  %s96_s15 = sand.u32 (%p41_p3), 1, %s535_s7  }
   0xf   : > { %s454_s16 = smul.u32 (%p41_p3), 40, %s543_s9 }
  0x10   : > { %s455_s17 = smul.u32 (%p41_p3), 120, %s96_s15 }
  0x11   : > { %s102_s20 = scalar_lea.vmem (%p41_p3), %s692_s0, %s454_s16 }
  0x12   : > { %v158_v0 = vld [vmem:[%s102_s20] sm:$0xff] (%p41_p3)  ;;  %v160_v1 = vld [vmem:[%s102_s20 + $0x8] sm:$0xff] (%p41_p3)  ;;  %v162_v2 = vld [vmem:[%s102_s20 + $0x10] sm:$0xff] (%p41_p3)  ;;  %s98_s21 = scalar_lea.vmem (%p41_p3), [#allocation2], %s455_s17 }
  0x13   : > { %159 = vst [vmem:[%s98_s21] sm:$0xff] (%p41_p3), %v158_v0  ;;  %161 = vst [vmem:[%s98_s21 + $0x8] sm:$0xff] (%p41_p3), %v160_v1  ;;  %v164_v3 = vld [vmem:[%s102_s20 + $0x18] sm:$0xff] (%p41_p3)  ;;  %v166_v4 = vld [vmem:[%s102_s20 + $0x20] sm:$0xff] (%p41_p3) }
  0x14   : > { %163 = vst [vmem:[%s98_s21 + $0x10] sm:$0xff] (%p41_p3), %v162_v2  ;;  %v168_v5 = vld [vmem:[%s102_s20 + $0x50] sm:$0xff] (%p41_p3)  ;;  %165 = vst [vmem:[%s98_s21 + $0x18] sm:$0xff] (%p41_p3), %v164_v3  ;;  %v170_v6 = vld [vmem:[%s102_s20 + $0x58] sm:$0xff] (%p41_p3) }
  0x15   : > { %167 = vst [vmem:[%s98_s21 + $0x20] sm:$0xff] %v166_v4  ;;  %169 = vst [vmem:[%s98_s21 + $0x28] sm:$0xff] %v168_v5  ;;  %v172_v7 = vld [vmem:[%s102_s20 + $0x60] sm:$0xff]  ;;  %v174_v8 = vld [vmem:[%s102_s20 + $0x68] sm:$0xff] }
  0x16   : > { %171 = vst [vmem:[%s98_s21 + $0x30] sm:$0xff] %v170_v6  ;;  %173 = vst [vmem:[%s98_s21 + $0x38] sm:$0xff] %v172_v7  ;;  %v176_v9 = vld [vmem:[%s102_s20 + $0x70] sm:$0xff]  ;;  %v178_v10 = vld [vmem:[%s102_s20 + $0xa0] sm:$0xff] }
  0x17   : > { %175 = vst [vmem:[%s98_s21 + $0x40] sm:$0xff] %v174_v8  ;;  %v180_v11 = vld [vmem:[%s102_s20 + $0xa8] sm:$0xff]  ;;  %177 = vst [vmem:[%s98_s21 + $0x48] sm:$0xff] %v176_v9  ;;  %v182_v12 = vld [vmem:[%s102_s20 + $0xb0] sm:$0xff] }
  0x18   : > { %179 = vst [vmem:[%s98_s21 + $0x50] sm:$0xff] %v178_v10  ;;  %181 = vst [vmem:[%s98_s21 + $0x58] sm:$0xff] %v180_v11  ;;  %v184_v13 = vld [vmem:[%s102_s20 + $0xb8] sm:$0xff]  ;;  %v186_v14 = vld [vmem:[%s102_s20 + $0xc0] sm:$0xff] }
  0x19   : > { %183 = vst [vmem:[%s98_s21 + $0x60] sm:$0xff] %v182_v12  ;;  %185 = vst [vmem:[%s98_s21 + $0x68] sm:$0xff] %v184_v13 }
  0x1a   : > { %187 = vst [vmem:[%s98_s21 + $0x70] sm:$0xff] %v186_v14 }
  0x1b PF: > { %p445_p6 = scmp.ge.s32.totalorder %s547_s10, 1  ;;  %p192_p7 = scmp.lt.s32.totalorder %s547_s10, 3 }
  0x1d   : > { %p193_p8 = pnand %p445_p6, %p192_p7 }
  0x1e   : > { %s199_s22 = sand.u32 (!%p193_p8), 1, %s531_s6   ;;  %v321_v15 = vlaneseq (!%p193_p8)  ;;  %s320_s25 = smul.u32 (!%p193_p8), 40, %s539_s8 }
  0x1f   : > { %196 = sbr.rel (%p193_p8) target bundleno = 68 (0x44), region = 58  ;;  %p220_p9 = scmp.lt.s32.totalorder (!%p193_p8), %s539_s8, 1 }
  0x20   : > { %s456_s23 = smul.u32 (!%p193_p8), 120, %s199_s22  ;;  %v322_v32 = vshrl.u32 (!%p193_p8), %v321_v15, 7  ;;  %v619_v39 = vstv (!%p193_p8), %s320_s25  ;;  %v627_v57 = vand.u32 (!%p193_p8), 127, %v321_v15 }
  0x22   : > { %s605_s24 = scalar_lea.vmem (!%p193_p8), [#allocation2], %s456_s23  ;;  %v323_v45 = vadd.s32 (!%p193_p8), 8, %v322_v32  ;;  %v330_v47 = vadd.s32 (!%p193_p8), %v619_v39, %v322_v32  ;;  %v324_v48 = vadd.s32 (!%p193_p8), 16, %v322_v32  ;;  %v325_v63 = vadd.s32 (!%p193_p8), 24, %v322_v32 }
  0x23   : > { %v234_v16 = vld [vmem:[%s605_s24] sm:$0xff] (!%p193_p8)  ;;  %v239_v17 = vld [vmem:[%s605_s24 + $0x28] sm:$0xff] (!%p193_p8)  ;;  %v244_v18 = vld [vmem:[%s605_s24 + $0x50] sm:$0xff] (!%p193_p8)  ;;  %v326_v13 = vadd.s32 (!%p193_p8), 32, %v322_v32 }
  0x24   : > { %v249_v19 = vmul.f32 (!%p193_p8), %v234_v16, %v234_v16  ;;  %v254_v20 = vmul.f32 (!%p193_p8), %v239_v17, %v239_v17  ;;  %v259_v21 = vmul.f32 (!%p193_p8), %v244_v18, %v244_v18  ;;  %v235_v22 = vld [vmem:[%s605_s24 + $0x8] sm:$0xff] (!%p193_p8)  ;;  %v240_v23 = vld [vmem:[%s605_s24 + $0x30] sm:$0xff] (!%p193_p8)  ;;  %v245_v24 = vld [vmem:[%s605_s24 + $0x58] sm:$0xff] (!%p193_p8)  ;;  %v331_v55 = vadd.s32 (!%p193_p8), %v619_v39, %v323_v45 }
  0x25   : > { %v250_v25 = vmul.f32 (!%p193_p8), %v235_v22, %v235_v22  ;;  %v255_v26 = vmul.f32 (!%p193_p8), %v240_v23, %v240_v23  ;;  %v260_v27 = vmul.f32 (!%p193_p8), %v245_v24, %v245_v24  ;;  %v236_v28 = vld [vmem:[%s605_s24 + $0x10] sm:$0xff] (!%p193_p8)  ;;  %v241_v29 = vld [vmem:[%s605_s24 + $0x38] sm:$0xff] (!%p193_p8)  ;;  %v246_v30 = vld [vmem:[%s605_s24 + $0x60] sm:$0xff] (!%p193_p8)  ;;  %v335_v58 = vmul.u32 (!%p193_p8), 128, %v330_v47 }
  0x26   : > { %v264_v31 = vadd.f32 %v254_v20, %v249_v19  ;;  %v251_v33 = vmul.f32 %v236_v28, %v236_v28  ;;  %v256_v34 = vmul.f32 %v241_v29, %v241_v29  ;;  %v237_v35 = vld [vmem:[%s605_s24 + $0x18] sm:$0xff]  ;;  %v242_v36 = vld [vmem:[%s605_s24 + $0x40] sm:$0xff]  ;;  %v261_v40 = vmul.f32 %v246_v30, %v246_v30  ;;  %v247_v46 = vld [vmem:[%s605_s24 + $0x68] sm:$0xff]  ;;  %s701_s8 = smov (!%p220_p9, %s539_s8), 1 }
  0x27   : > { %v266_v37 = vadd.f32 %v255_v26, %v250_v25  ;;  %v252_v43 = vmul.f32 %v237_v35, %v237_v35  ;;  %v257_v44 = vmul.f32 %v242_v36, %v242_v36  ;;  %v238_v49 = vld [vmem:[%s605_s24 + $0x20] sm:$0xff]  ;;  %v262_v51 = vmul.f32 %v247_v46, %v247_v46  ;;  %v243_v53 = vld [vmem:[%s605_s24 + $0x48] sm:$0xff]  ;;  %v248_v54 = vld [vmem:[%s605_s24 + $0x70] sm:$0xff]  ;;  %s457_s26 = smul.u32 40, %s701_s8 }
  0x28   : > { %v265_v38 = vadd.f32 %v264_v31, %v259_v21  ;;  %v268_v41 = vadd.f32 %v256_v34, %v251_v33  ;;  %v253_v56 = vmul.f32 %v238_v49, %v238_v49  ;;  %v332_v59 = vadd.s32 %v619_v39, %v324_v48 }
  0x29   : > { %v267_v42 = vadd.f32 %v266_v37, %v260_v27  ;;  %v270_v52 = vadd.f32 %v257_v44, %v252_v43  ;;  %v258_v61 = vmul.f32 %v243_v53, %v243_v53  ;;  %v263_v62 = vmul.f32 %v248_v54, %v248_v54  ;;  %s661_s29 = scalar_lea.vmem %s693_s1, %s457_s26 }
  0x2a   : > { %499 = vrsqrt.f32 %v265_v38  ;;  %v269_v50 = vadd.f32 %v268_v41, %v261_v40  ;;  %v336_v0 = vmul.u32 128, %v331_v55  ;;  %vm276_vm0 = vcmp.eq.f32.partialorder %v265_v38, inf }
  0x2b   : > { %501 = vrsqrt.f32 %v267_v42  ;;  %v630_v60 = vadd.f32 %v270_v52, %v262_v51  ;;  %v272_v1 = vadd.f32 %v258_v61, %v253_v56  ;;  %v340_v2 = vadd.s32 %v335_v58, %v627_v57 }
  0x2c   : > { %503 = vrsqrt.f32 %v269_v50  ;;  %v337_v3 = vmul.u32 128, %v332_v59  ;;  %vm278_vm1 = vcmp.eq.f32.partialorder %v265_v38, 0.0  ;;  %v279_v5 = vand.u32 2147483648, %v265_v38 }
  0x2d   : > { %505 = vrsqrt.f32 %v630_v60  ;;  %vm283_vm2 = vcmp.eq.f32.partialorder %v267_v42, inf  ;;  %v635_v6 = vadd.f32 %v272_v1, %v263_v62  ;;  %vm285_vm3 = vcmp.eq.f32.partialorder %v267_v42, 0.0 }
  0x2e   : > { %v286_v9 = vand.u32 2147483648, %v267_v42  ;;  %v333_v10 = vadd.s32 %v619_v39, %v325_v63  ;;  %v341_v12 = vadd.s32 %v336_v0, %v627_v57  ;;  %vm290_vm4 = vcmp.eq.f32.partialorder %v269_v50, inf }
  0x2f   : > { %507 = vrsqrt.f32 %v635_v6  ;;  %v342_v15 = vadd.s32 %v337_v3, %v627_v57  ;;  %vm292_vm5 = vcmp.eq.f32.partialorder %v269_v50, 0.0  ;;  %v293_v19 = vand.u32 2147483648, %v269_v50 }
  0x30   : > { %v338_v23 = vmul.u32 128, %v333_v10  ;;  %vm345_vm6 = vcmp.lt.s32.totalorder %v340_v2, 8496  ;;  %vm346_vm7 = vcmp.lt.s32.totalorder %v341_v12, 8496  ;;  %v334_v25 = vadd.s32 %v619_v39, %v326_v13 }
  0x31   : > { %vm297_vm8 = vcmp.eq.f32.partialorder %v630_v60, inf  ;;  %v300_v29 = vand.u32 2147483648, %v630_v60  ;;  %vm299_vm9 = vcmp.eq.f32.partialorder %v630_v60, 0.0  ;;  %vm347_vm10 = vcmp.lt.s32.totalorder %v342_v15, 8496 }
  0x32   : > { %v343_v35 = vadd.s32 %v338_v23, %v627_v57  ;;  %vm304_vm11 = vcmp.eq.f32.partialorder %v635_v6, inf  ;;  %v307_v43 = vand.u32 2147483648, %v635_v6  ;;  %vm306_vm13 = vcmp.eq.f32.partialorder %v635_v6, 0.0 }
  0x34   : > { %v500_v4 = vpop.eup %499  ;;  %vm348_vm12 = vcmp.lt.s32.totalorder %v343_v35, 8496 }
  0x35   : > { %v502_v7 = vpop.eup %501  ;;  %v275_v8 = vmul.f32 %v500_v4, %v265_v38 }
  0x36   : > { %v282_v11 = vmul.f32 %v502_v7, %v267_v42  ;;  %v504_v16 = vpop.eup %503 }
  0x37   : > { %v277_v14 = vsel %vm276_vm0, %v265_v38, %v275_v8  ;;  %v289_v22 = vmul.f32 %v504_v16, %v269_v50  ;;  %v506_v26 = vpop.eup %505  ;;  %v339_v38 = vmul.u32 128, %v334_v25 }
  0x38   : > { %v280_v17 = vsel %vm278_vm1, %v279_v5, %v277_v14  ;;  %v284_v18 = vsel %vm283_vm2, %v267_v42, %v282_v11  ;;  %v296_v32 = vmul.f32 %v506_v26, %v630_v60 }
  0x39   : > { %v447_v20 = vadd.f32 -1.0, %v280_v17  ;;  %v287_v21 = vsel %vm285_vm3, %v286_v9, %v284_v18  ;;  %v291_v28 = vsel %vm290_vm4, %v269_v50, %v289_v22  ;;  %v508_v41 = vpop.eup %507  ;;  %v344_v47 = vadd.s32 %v339_v38, %v627_v57 }
  0x3a   : > { %v448_v24 = vadd.f32 -1.0, %v287_v21  ;;  %v294_v31 = vsel %vm292_vm5, %v293_v19, %v291_v28  ;;  %v298_v37 = vsel %vm297_vm8, %v630_v60, %v296_v32  ;;  %v303_v45 = vmul.f32 %v508_v41, %v635_v6 }
  0x3b   : > { %v314_v27 = vmul.f32 %v447_v20, %v447_v20  ;;  %v449_v34 = vadd.f32 -1.0, %v294_v31  ;;  %v301_v40 = vsel %vm299_vm9, %v300_v29, %v298_v37  ;;  %vm349_vm14 = vcmp.lt.s32.totalorder %v344_v47, 8496 }
  0x3c   : > { %v315_v30 = vmul.f32 %v448_v24, %v448_v24  ;;  %v450_v42 = vadd.f32 -1.0, %v301_v40  ;;  %v305_v48 = vsel %vm304_vm11, %v635_v6, %v303_v45 }
  0x3d   : > { %v350_v33 = vsel %vm345_vm6, %v314_v27, 0.0  ;;  %v316_v39 = vmul.f32 %v449_v34, %v449_v34  ;;  %v308_v50 = vsel %vm306_vm13, %v307_v43, %v305_v48 }
  0x3e   : > { %v351_v36 = vsel %vm346_vm7, %v315_v30, 0.0  ;;  %365 = vst [vmem:[%s661_s29] sm:$0xff] %v350_v33  ;;  %v317_v46 = vmul.f32 %v450_v42, %v450_v42  ;;  %v451_v51 = vadd.f32 -1.0, %v308_v50 }
  0x3f   : > { %366 = vst [vmem:[%s661_s29 + $0x8] sm:$0xff] %v351_v36  ;;  %v352_v44 = vsel %vm347_vm10, %v316_v39, 0.0 }
  0x40   : > { %367 = vst [vmem:[%s661_s29 + $0x10] sm:$0xff] %v352_v44  ;;  %v353_v49 = vsel %vm348_vm12, %v317_v46, 0.0  ;;  %v318_v52 = vmul.f32 %v451_v51, %v451_v51 }
  0x41   : > { %368 = vst [vmem:[%s661_s29 + $0x18] sm:$0xff] %v353_v49 }
  0x42   : > { %v354_v53 = vsel %vm349_vm14, %v318_v52, 0.0 }
  0x43   : > { %369 = vst [vmem:[%s661_s29 + $0x20] sm:$0xff] %v354_v53 }
  0x44 PF: > { %s11_s10 = sadd.s32 1, %s547_s10   ;;  %s694_s6 = smov %s535_s7 }
  0x45   : > { %p8_p10 = scmp.ge.s32.totalorder %s11_s10, 4   ;;  %s695_s7 = smov %s594_s14 }
  0x46   : > { %s696_s8 = smov %s543_s9  ;;  %s697_s9 = smov %s699_s11 }
  0x47   :  { %10 = sbr.rel (!%p8_p10) target bundleno = 3 (0x3), region = 101 }

</bundles_post_ra>
